<compile_context>
chip_gen: v7x
topology: tpu7x:2x2x1
jax: 0.10.0
libtpu: 0.0.40
codegen_flags: <defaults>
</compile_context>

<pallas_src>
import jax
import jax.numpy as jnp
import numpy as np
from jax.experimental import pallas as pl
from jax.experimental.pallas import tpu as pltpu


def _round_up(x, m):
    return ((x + m - 1) // m) * m


def _moments_kernel(inv2ls_ref, xtest_ref, xtrain_ref, xr2_ref, zy_ref,
                    out_ref, acc_ref):
    """One (test-tile i, train-tile k) grid step.

    Computes the RBF gram tile K = exp(-||xtest_i - xtrain_k||^2 / (2 ls^2))
    and accumulates the fused weighted moments
        acc[i] += K @ [ vec(xtild xtild^T) | y * xtild ]   (lane-dense, 128-pad)
    over the train-tile axis k; written back to HBM on the last k step.
    """
    k = pl.program_id(1)

    @pl.when(k == 0)
    def _init():
        acc_ref[...] = jnp.zeros_like(acc_ref)

    xt = xtest_ref[...]                                    # (TM, d) f32
    xr = xtrain_ref[...]                                   # (TK, d) f32

    # Squared distances via ||a||^2 + ||b||^2 - 2 a.b.  The cross term only
    # contracts over d (tiny), so HIGHEST here is ~free and keeps the exponent
    # accurate.  NOTE: distances use raw Xtest/Xtrain (no bias column).
    xt2 = jnp.sum(xt * xt, axis=-1, keepdims=True)         # (TM, 1)
    cross = jax.lax.dot_general(
        xt, xr, (((1,), (1,)), ((), ())),
        preferred_element_type=jnp.float32,
        precision=jax.lax.Precision.HIGHEST)               # (TM, TK)
    sq = jnp.maximum(xt2 + xr2_ref[...] - 2.0 * cross, 0.0)

    # exp stays in f32 (EUP); only the MXU operand is cast to bf16.
    gram_bf16 = jnp.exp(sq * inv2ls_ref[0, 0]).astype(jnp.bfloat16)

    acc_ref[...] += jnp.dot(gram_bf16, zy_ref[...],
                            preferred_element_type=jnp.float32)

    @pl.when(k == pl.num_programs(1) - 1)
    def _writeback():
        out_ref[...] = acc_ref[...]


def ll_functional_forward(Ytrain, Xtrain, Xtest, *, log_lengthscale=0.0,
                          reg=1e-6, tile_m=256, tile_k=512):
    Xtrain = jnp.asarray(Xtrain, jnp.float32)
    Xtest = jnp.asarray(Xtest, jnp.float32)
    Ytrain = jnp.asarray(Ytrain, jnp.float32)

    n_train, d = Xtrain.shape
    n_test = Xtest.shape[0]
    p = d + 1
    f = p * p + p                           # fused [vec(xx^T) | y*x] width
    f_pad = _round_up(f, 128)               # lane-dense output -> unmasked vst

    # ---- tile sizes & padding (8/128 alignment). Default tiles (<=256 x 512,
    #      f_pad=128) use ~3 MiB VMEM -> safe on v5e/v6e/v7x default limits. ---
    tm = _round_up(min(tile_m, _round_up(max(n_test, 8), 8)), 8)
    tk = _round_up(min(tile_k, _round_up(max(n_train, 128), 128)), 128)
    nte = _round_up(n_test, tm)
    ntr = _round_up(n_train, tk)

    # ---- feature tables (plain-JAX prep; Z/Yf fused, zero-padded rows so
    #      padded train samples contribute 0 regardless of their K value) -----
    Xtild = jnp.concatenate([jnp.ones((n_train, 1), jnp.float32), Xtrain], axis=1)
    Z = (Xtild[:, :, None] * Xtild[:, None, :]).reshape(n_train, p * p)
    Yf = Xtild * Ytrain
    ZY = jnp.concatenate([Z, Yf], axis=1)                              # (n_train, f)
    ZY = jnp.pad(ZY, ((0, ntr - n_train), (0, f_pad - f))).astype(jnp.bfloat16)
    Xtrain_p = jnp.pad(Xtrain, ((0, ntr - n_train), (0, 0)))
    Xtest_p = jnp.pad(Xtest, ((0, nte - n_test), (0, 0)))
    xr2 = jnp.pad(jnp.sum(Xtrain * Xtrain, axis=-1), (0, ntr - n_train))[None, :]

    ls = jnp.exp(jnp.asarray(log_lengthscale, jnp.float32))
    inv2ls = (-0.5 / (ls * ls)).reshape(1, 1)                          # SMEM scalar

    grid = (nte // tm, ntr // tk)
    xwzy = pl.pallas_call(
        _moments_kernel,
        out_shape=jax.ShapeDtypeStruct((nte, f_pad), jnp.float32),
        grid_spec=pltpu.PrefetchScalarGridSpec(
            num_scalar_prefetch=0,
            grid=grid,
            in_specs=[
                pl.BlockSpec(memory_space=pltpu.MemorySpace.SMEM),     # inv2ls
                pl.BlockSpec((tm, d), lambda i, k: (i, 0)),            # Xtest tile
                pl.BlockSpec((tk, d), lambda i, k: (k, 0)),            # Xtrain tile
                pl.BlockSpec((1, tk), lambda i, k: (0, k)),            # ||Xtrain||^2
                pl.BlockSpec((tk, f_pad), lambda i, k: (k, 0)),        # fused [Z|Yf]
            ],
            out_specs=pl.BlockSpec((tm, f_pad), lambda i, k: (i, 0)),
            scratch_shapes=[pltpu.VMEM((tm, f_pad), jnp.float32)],
        ),
        compiler_params=pltpu.CompilerParams(
            dimension_semantics=("parallel", "arbitrary")),
    )(inv2ls, Xtest_p, Xtrain_p, xr2, ZY)

    # ---- tiny per-test dense solve + prediction (plain JAX; XLA fuses) ------
    xwzy = xwzy[:n_test]                                   # drop padded test rows
    XWX = xwzy[:, :p * p].reshape(n_test, p, p) + reg * jnp.eye(p, dtype=jnp.float32)
    XWy = xwzy[:, p * p:f]
    # TODO(synk): the per-test (d+1)x(d+1) torch.linalg.solve has no clean
    # Pallas equivalent; done with batched jnp.linalg.solve in plain JAX.
    beta = jnp.linalg.solve(XWX, XWy[..., None])[..., 0]               # (n_test, p)
    xtest_tild = jnp.concatenate([jnp.ones((n_test, 1), jnp.float32), Xtest], axis=1)
    return jnp.sum(xtest_tild * beta, axis=-1, keepdims=True)


def ll_functional_reference(Ytrain, Xtrain, Xtest, *, log_lengthscale=0.0,
                            reg=1e-6):
    """Float64 numpy transcription of the PyTorch forward loop (ground truth)."""
    X = np.asarray(Xtrain, np.float64)
    Xt = np.asarray(Xtest, np.float64)
    Y = np.asarray(Ytrain, np.float64)
    ls = float(np.exp(log_lengthscale))
    sq = ((Xt[:, None, :] - X[None, :, :]) ** 2).sum(-1)
    K = np.exp(-0.5 * sq / (ls * ls))
    n_train, d = X.shape
    Xtild = np.concatenate([np.ones((n_train, 1)), X], axis=1)
    preds = []
    for i in range(Xt.shape[0]):
        K_i = K[i][:, None]
        W = K_i * Xtild
        XWX = Xtild.T @ W
        XWy = (Xtild.T @ (Y * K_i))[:, 0]
        beta = np.linalg.solve(XWX + reg * np.eye(d + 1), XWy)
        x_test_tild = np.concatenate([np.ones((1,)), Xt[i]])
        preds.append(x_test_tild @ beta)
    return np.stack(preds)[:, None]


if __name__ == "__main__":
    key = jax.random.PRNGKey(0)
    k1, k2, k3 = jax.random.split(key, 3)
    n_train, n_test, d = 300, 24, 4
    Xtrain = jax.random.normal(k1, (n_train, d), jnp.float32) * 0.5
    Xtest = jax.random.normal(k2, (n_test, d), jnp.float32) * 0.5
    Ytrain = jax.random.normal(k3, (n_train, 1), jnp.float32)

    # Small tiles so the demo exercises a (2, 3) grid: parallel test tiles,
    # accumulated train tiles, and padding in both axes (24->32, 300->384).
    ypred = jax.block_until_ready(
        ll_functional_forward(Ytrain, Xtrain, Xtest, tile_m=16, tile_k=128))

    yref = ll_functional_reference(np.asarray(Ytrain), np.asarray(Xtrain),
                                   np.asarray(Xtest))
    assert ypred.shape == (n_test, 1), ypred.shape
    yk = np.asarray(ypred, np.float64)
    # Tolerance accounts for bf16 MXU operands (K, [Z|Yf]) with f32 accumulation.
    assert np.allclose(yk, yref, atol=5e-3, rtol=2e-2), (
        f"max abs err = {float(np.max(np.abs(yk - yref)))}")
    print("KERNEL_OK")
</pallas_src>

<mosaic_0001>
module attributes {stable_mosaic.version = 11 : i64} {
  func.func @_moments_kernel(%arg0: i32, %arg1: i32, %arg2: memref<1x1xf32, #tpu.memory_space<smem>>, %arg3: memref<16x4xf32, #tpu.memory_space<vmem>>, %arg4: memref<128x4xf32, #tpu.memory_space<vmem>>, %arg5: memref<1x128xf32, #tpu.memory_space<vmem>>, %arg6: memref<128x128xbf16, #tpu.memory_space<vmem>>, %arg7: memref<16x128xf32, #tpu.memory_space<vmem>>, %arg8: memref<16x128xf32, #tpu.memory_space<vmem>>) attributes {dimension_semantics = [#tpu.dimension_semantics<parallel>, #tpu.dimension_semantics<arbitrary>], iteration_bounds = array<i64: 2, 3>, scalar_prefetch = 0 : i64, scratch_operands = 1 : i64, tpu.core_type = #tpu.core_type<tc>, window_params = [{transform_indices = @transform_0, window_bounds = array<i64: 1, 1>}, {transform_indices = @transform_1, window_bounds = array<i64: 16, 4>}, {transform_indices = @transform_2, window_bounds = array<i64: 128, 4>}, {transform_indices = @transform_3, window_bounds = array<i64: 1, 128>}, {transform_indices = @transform_4, window_bounds = array<i64: 128, 128>}, {transform_indices = @transform_5, window_bounds = array<i64: 16, 128>}]} {
    %c0_i32 = arith.constant 0 : i32
    %0 = arith.cmpi eq, %arg1, %c0_i32 : i32
    %1 = arith.extui %0 : i1 to i32
    %c0_i32_0 = arith.constant 0 : i32
    %2 = arith.cmpi ne, %1, %c0_i32_0 : i32
    scf.if %2 {
      %cst_19 = arith.constant 0.000000e+00 : f32
      %31 = vector.broadcast %cst_19 : f32 to vector<16x128xf32>
      %c0_20 = arith.constant 0 : index
      %c0_21 = arith.constant 0 : index
      %32 = vector.load %arg8[%c0_20, %c0_21] : memref<16x128xf32, #tpu.memory_space<vmem>>, vector<16x128xf32>
      tpu.vector_store %arg8[%c0_20, %c0_21], %31 {strides = array<i32>} : memref<16x128xf32, #tpu.memory_space<vmem>>, vector<16x128xf32>,
    } else {
    }
    %c0 = arith.constant 0 : index
    %c0_1 = arith.constant 0 : index
    %3 = vector.load %arg3[%c0, %c0_1] : memref<16x4xf32, #tpu.memory_space<vmem>>, vector<16x4xf32>
    %c0_2 = arith.constant 0 : index
    %c0_3 = arith.constant 0 : index
    %4 = vector.load %arg4[%c0_2, %c0_3] : memref<128x4xf32, #tpu.memory_space<vmem>>, vector<128x4xf32>
    %5 = arith.mulf %3, %3 : vector<16x4xf32>
    %cst = arith.constant dense<0.000000e+00> : vector<16xf32>
    %6 = vector.multi_reduction <add>, %5, %cst [1] : vector<16x4xf32> to vector<16xf32>
    %7 = vector.shape_cast %6 : vector<16xf32> to vector<16x1xf32>
    %cst_4 = arith.constant dense<0.000000e+00> : vector<16x128xf32>
    %8 = tpu.matmul %3, %4, %cst_4 {dimension_numbers = #tpu.dot_dimension_numbers<[1], [1], [0], [0], [0, 0, 1, 0], [], []>, precision = #tpu.contract_precision<fp32>} : vector<16x4xf32>, vector<128x4xf32>, vector<16x128xf32> -> vector<16x128xf32>
    %c0_5 = arith.constant 0 : index
    %c0_6 = arith.constant 0 : index
    %9 = vector.load %arg5[%c0_5, %c0_6] : memref<1x128xf32, #tpu.memory_space<vmem>>, vector<1x128xf32>
    %10 = vector.broadcast %7 : vector<16x1xf32> to vector<16x128xf32>
    %11 = vector.broadcast %9 : vector<1x128xf32> to vector<16x128xf32>
    %12 = arith.addf %10, %11 : vector<16x128xf32>
    %cst_7 = arith.constant 2.000000e+00 : f32
    %13 = vector.broadcast %cst_7 : f32 to vector<16x128xf32>
    %14 = arith.mulf %13, %8 : vector<16x128xf32>
    %15 = arith.subf %12, %14 : vector<16x128xf32>
    %cst_8 = arith.constant 0.000000e+00 : f32
    %16 = vector.broadcast %cst_8 : f32 to vector<16x128xf32>
    %17 = arith.maximumf %15, %16 : vector<16x128xf32>
    %c0_9 = arith.constant 0 : index
    %c0_10 = arith.constant 0 : index
    %18 = memref.load %arg2[%c0_9, %c0_10] : memref<1x1xf32, #tpu.memory_space<smem>>
    %19 = vector.broadcast %18 : f32 to vector<16x128xf32>
    %20 = arith.mulf %17, %19 : vector<16x128xf32>
    %21 = math.exp %20 : vector<16x128xf32>
    %22 = arith.truncf %21 : vector<16x128xf32> to vector<16x128xbf16>
    %c0_11 = arith.constant 0 : index
    %c0_12 = arith.constant 0 : index
    %23 = vector.load %arg8[%c0_11, %c0_12] : memref<16x128xf32, #tpu.memory_space<vmem>>, vector<16x128xf32>
    %c0_13 = arith.constant 0 : index
    %c0_14 = arith.constant 0 : index
    %24 = vector.load %arg6[%c0_13, %c0_14] : memref<128x128xbf16, #tpu.memory_space<vmem>>, vector<128x128xbf16>
    %cst_15 = arith.constant dense<0.000000e+00> : vector<16x128xf32>
    %25 = tpu.matmul %22, %24, %cst_15 {dimension_numbers = #tpu.dot_dimension_numbers<[1], [0], [0], [1], [0, 0, 1, 1], [], []>} : vector<16x128xbf16>, vector<128x128xbf16>, vector<16x128xf32> -> vector<16x128xf32>
    %26 = arith.addf %23, %25 : vector<16x128xf32>
    %c0_16 = arith.constant 0 : index
    %c0_17 = arith.constant 0 : index
    %27 = vector.load %arg8[%c0_16, %c0_17] : memref<16x128xf32, #tpu.memory_space<vmem>>, vector<16x128xf32>
    tpu.vector_store %arg8[%c0_16, %c0_17], %26 {strides = array<i32>} : memref<16x128xf32, #tpu.memory_space<vmem>>, vector<16x128xf32>,
    %c2_i32 = arith.constant 2 : i32
    %28 = arith.cmpi eq, %arg1, %c2_i32 : i32
    %29 = arith.extui %28 : i1 to i32
    %c0_i32_18 = arith.constant 0 : i32
    %30 = arith.cmpi ne, %29, %c0_i32_18 : i32
    scf.if %30 {
      %c0_19 = arith.constant 0 : index
      %c0_20 = arith.constant 0 : index
      %31 = vector.load %arg8[%c0_19, %c0_20] : memref<16x128xf32, #tpu.memory_space<vmem>>, vector<16x128xf32>
      %c0_21 = arith.constant 0 : index
      %c0_22 = arith.constant 0 : index
      %32 = vector.load %arg7[%c0_21, %c0_22] : memref<16x128xf32, #tpu.memory_space<vmem>>, vector<16x128xf32>
      tpu.vector_store %arg7[%c0_21, %c0_22], %31 {strides = array<i32>} : memref<16x128xf32, #tpu.memory_space<vmem>>, vector<16x128xf32>,
    } else {
    }
    return
  }
  func.func @transform_0(%arg0: i32, %arg1: i32) -> (i32, i32) {
    %c0_i32 = arith.constant 0 : i32
    %c0_i32_0 = arith.constant 0 : i32
    %c0_i32_1 = arith.constant 0 : i32
    return %c0_i32, %c0_i32_0 : i32, i32
  }
  func.func @transform_1(%arg0: i32, %arg1: i32) -> (i32, i32) {
    %c0_i32 = arith.constant 0 : i32
    %c0_i32_0 = arith.constant 0 : i32
    return %arg0, %c0_i32 : i32, i32
  }
  func.func @transform_2(%arg0: i32, %arg1: i32) -> (i32, i32) {
    %c0_i32 = arith.constant 0 : i32
    %c0_i32_0 = arith.constant 0 : i32
    return %arg1, %c0_i32 : i32, i32
  }
  func.func @transform_3(%arg0: i32, %arg1: i32) -> (i32, i32) {
    %c0_i32 = arith.constant 0 : i32
    %c0_i32_0 = arith.constant 0 : i32
    return %c0_i32, %arg1 : i32, i32
  }
  func.func @transform_4(%arg0: i32, %arg1: i32) -> (i32, i32) {
    %c0_i32 = arith.constant 0 : i32
    %c0_i32_0 = arith.constant 0 : i32
    return %arg1, %c0_i32 : i32, i32
  }
  func.func @transform_5(%arg0: i32, %arg1: i32) -> (i32, i32) {
    %c0_i32 = arith.constant 0 : i32
    %c0_i32_0 = arith.constant 0 : i32
    return %arg0, %c0_i32 : i32, i32
  }
}

</mosaic_0001>

<bundles_post_ra>
// kernel: tpu_custom_call.1
= control target key start
LH: loop header
LB: loop body
LE: loop exit
PB: predicated region body
PF: predicated region fallthrough
CT: control target
= control target key end

     0   :  { %s2553_s0 = inlined_call_operand.<no memory space> [shape: f32[1,1], index: 0, kind: input, shape index: {}]   ;;  %s2554_s1 = inlined_call_operand.vmem [shape: f32[32,4], index: 1, kind: input, shape index: {}]   ;;  %s2555_s2 = inlined_call_operand.vmem [shape: f32[384,4], index: 2, kind: input, shape index: {}]   ;;  %s2556_s3 = inlined_call_operand.vmem [shape: f32[1,384], index: 3, kind: input, shape index: {}]   ;;  %s2557_s4 = inlined_call_operand.vmem [shape: bf16[384,128], index: 4, kind: input, shape index: {}]   ;;  %s2558_s5 = inlined_call_operand.hbm [shape: f32[32,128], index: 5, kind: output, shape index: {}]  }
   0x1   :  { %10 = sst [smem:[#allocation3]] %s2553_s0 }
   0x2   :  { %11 = vsyncpa [#allocation5], 0 }
   0x3   :  { %13 = vsyncpa [#allocation5 + $0x1], 0  ;;  %s2133_s20 = smov 0   ;;  %s2135_s21 = smov 0  }
   0x4   :  { %s2137_s22 = smov 0   ;;  %s2139_s23 = smov 0  }
   0x5   :  { %s2141_s24 = smov 0   ;;  %s2143_s25 = smov 0  }
   0x6   :  { %s2145_s26 = smov 0   ;;  %s2147_s27 = smov 0  }
   0x7 LB: > { %2563 = sst [smem:[#allocation7_spill]] %s2084_s25  ;;  %s1332_s0 = sadd.s32 4294967295, %s2092_s27   ;;  %s2092_s27 = sphi %s2147_s27, %s19_s27   ;;  %s2088_s26 = sphi %s2145_s26, %s2573_s26   ;;  %s2084_s25 = sphi %s2143_s25, %s2572_s25   ;;  %s2080_s24 = sphi %s2141_s24, %s2571_s24   ;;  %s2076_s23 = sphi %s2139_s23, %s2570_s23   ;;  %s2072_s22 = sphi %s2137_s22, %s2576_s22   ;;  %s2068_s21 = sphi %s2135_s21, %s2575_s21   ;;  %s2064_s20 = sphi %s2133_s20, %s2574_s20  }
   0x8   : > { %2564 = sst [smem:[#allocation8_spill]] %s2088_s26  ;;  %s1333_s28 = sadd.s32 4294967294, %s2092_s27  }
   0x9   : > { %s28_s29 = sadd.s32 1, %s2084_s25  ;;  %s31_s30 = sadd.s32 1, %s2088_s26 }
   0xa   : > { %p29_p0 = scmp.ge.s32.totalorder %s28_s29, 3  ;;  %p173_p1 = scmp.ne.s32.totalorder %s2072_s22, %s2068_s21 }
   0xb   : > { %p174_p2 = scmp.eq.s32.totalorder %s1332_s0, 5  ;;  %p179_p4 = scmp.ne.s32.totalorder %s2068_s21, %s2064_s20 }
   0xc   : > { %s2578_s29 = smov (%p29_p0, %s28_s29), 0  ;;  %s2580_s30 = smov (!%p29_p0, %s31_s30), %s2088_s26 }
   0xd   : > { %2565 = sst [smem:[#allocation9_spill]] %s2578_s29  ;;  %p2182_p3 = por %p174_p2, %p173_p1 }
   0xe   : > { %p33_p5 = scmp.ge.s32.totalorder %s2580_s30, 2  ;;  %p180_p6 = scmp.eq.s32.totalorder %s1333_s28, 5 }
   0xf   : > { %p1336_p7 = scmp.ge.s32.totalorder %s2092_s27, 1  ;;  %p234_p8 = scmp.lt.s32.totalorder %s2092_s27, 7 }
  0x10   : > { %s2582_s30 = smov (%p33_p5, %s2580_s30), 0  ;;  %p2192_p9 = por %p180_p6, %p179_p4 }
  0x11   : > { %2567 = sst [smem:[#allocation10_spill]] %s2582_s30  ;;  %p235_p10 = pnand %p1336_p7, %p234_p8 }
  0x12   : > { %s160_s8 = ssub.s32 %s2088_s26, %s2582_s30  ;;  %s163_s9 = sadd.s32 1, %s2072_s22 }
  0x13   : > { %p161_p11 = scmp.eq.s32.totalorder %s160_s8, 0  ;;  %238 = sbr.rel (%p235_p10) target bundleno = 725 (0x2d5), region = 40 }
  0x14   : > { %s2559_s11 = sand.u32 (!%p235_p10), 1, %s2068_s21   ;;  %s1338_s12 = sshll.u32 (!%p235_p10), %s2080_s24, 1 }
  0x15   : > { %s2200_s10 = scalar_select %p161_p11, %s2072_s22, %s163_s9  }
  0x16   : > { %s1337_s13 = sshll.u32 (!%p235_p10), %s2559_s11, 4  ;;  %p276_p12 = scmp.lt.s32.totalorder (!%p235_p10), %s1338_s12, 3 }
  0x17   : > { %s1340_s14 = sshll.u32 (!%p235_p10), %s2076_s23, 4  ;;  %p287_p0 = scmp.lt.s32.totalorder (!%p235_p10), %s2076_s23, 2 }
  0x18   : > { %p282_p13 = scmp.lt.s32.totalorder (!%p235_p10), %s1340_s14, 47  ;;  %s2230_s16 = scalar_lea.vmem (!%p235_p10), [#allocation4], %s1337_s13 }
  0x19   : > { %p1344_p1 = scmp.ne.s32.totalorder (!%p235_p10), %s2076_s23, 0 }
  0x1a   : > { %s2584_s12 = smov (!%p276_p12, %s1338_s12), 3  ;;  %s2586_s14 = smov (!%p282_p13, %s1340_s14), 47 }
  0x1b   : > { %s1339_s15 = sshll.u32 %s2584_s12, 3  ;;  %s1341_s0 = sshll.u32 %s2586_s14, 3  ;;  %v2094_v0 = vmov (!%p1344_p1), 0.0  }
  0x1c   : > { %s2211_s18 = scalar_lea.vmem %s2554_s1, %s1339_s15  ;;  %s1343_s28 = sshll.u32 %s2586_s14, 2  ;;  %302 = vst [vmem:[#allocation2] sm:$0xff] (!%p1344_p1), %v2094_v0  ;;  %303 = vst [vmem:[#allocation2 + $0x8] sm:$0xff] (!%p1344_p1), %v2094_v0 }
  0x1d   : > { %s2214_s19 = scalar_select %p287_p0, %s2076_s23, 2 }
  0x1e   : > { %s2219_s11 = scalar_lea.vmem %s2555_s2, %s1341_s0  ;;  %s2228_s15 = scalar_lea.vmem %s2557_s4, %s1343_s28 }
  0x1f   : > { %s289_s12 = scalar_lea.vmem %s2556_s3, %s2214_s19  ;;  %301 = sbr.rel (%p1344_p1) target bundleno = 38 (0x26), region = 44 }
  0x26 PF: > { %v306_v1 = vld [vmem:[%s2219_s11] sm:$0xff]  ;;  %v307_v2 = vld [vmem:[%s2219_s11 + $0x8] sm:$0xff]  ;;  %vm324_vm0 = vcmask 31744   ;;  %v308_v3 = vld [vmem:[%s2219_s11 + $0x10] sm:$0xff]  ;;  %vm2096_vm1 = vmmov 0   ;;  %s1084_s25 = sld [smem:[#allocation3]] }
  0x27   : > { %v338_v4 = vsel %vm324_vm0, %v306_v1, 0  ;;  %v341_v5 = vsel %vm324_vm0, %v307_v2, 0  ;;  %v309_v6 = vld [vmem:[%s2219_s11 + $0x18] sm:$0xff]  ;;  %v344_v7 = vsel %vm324_vm0, %v308_v3, 0  ;;  %v310_v12 = vld [vmem:[%s2219_s11 + $0x20] sm:$0xff]  ;;  %v311_v13 = vld [vmem:[%s2219_s11 + $0x28] sm:$0xff] }
  0x28   : > { %v386_v8 = vand.u32 4294901760, %v338_v4  ;;  %v389_v9 = vand.u32 4294901760, %v341_v5  ;;  %v347_v10 = vsel %vm324_vm0, %v309_v6, 0  ;;  %v392_v11 = vand.u32 4294901760, %v344_v7  ;;  %v2254_v19 = vld [vmem:[%s2211_s18] sm:$0xff]  ;;  %v312_v22 = vld [vmem:[%s2219_s11 + $0x30] sm:$0xff] }
  0x29   : > { %v395_v14 = vand.u32 4294901760, %v347_v10  ;;  %v350_v17 = vsel %vm324_vm0, %v310_v12, 0  ;;  %v353_v18 = vsel %vm324_vm0, %v311_v13, 0  ;;  %v313_v23 = vld [vmem:[%s2219_s11 + $0x38] sm:$0xff]  ;;  %v332_v24 = vsel %vm324_vm0, %v2254_v19, 0  ;;  %v314_v33 = vld [vmem:[%s2219_s11 + $0x40] sm:$0xff] }
  0x2a   : > { %v2243_v15 = vpack.c.bf16 %v389_v9, %v386_v8  ;;  %v398_v20 = vand.u32 4294901760, %v350_v17  ;;  %v401_v21 = vand.u32 4294901760, %v353_v18  ;;  %v2262_v25 = vand.u32 4294901760, %v332_v24  ;;  %v315_v34 = vld [vmem:[%s2219_s11 + $0x48] sm:$0xff]  ;;  %v316_v42 = vld [vmem:[%s2219_s11 + $0x50] sm:$0xff]  ;;  %v317_v43 = vld [vmem:[%s2219_s11 + $0x58] sm:$0xff] }
  0x2b   : > { %v2245_v16 = vpack.c.bf16 %v395_v14, %v392_v11  ;;  %v356_v27 = vsel %vm324_vm0, %v312_v22, 0  ;;  %v359_v28 = vsel %vm324_vm0, %v313_v23, 0  ;;  %v362_v38 = vsel %vm324_vm0, %v314_v33, 0  ;;  %v318_v62 = vld [vmem:[%s2219_s11 + $0x60] sm:$0xff]  ;;  %v319_v63 = vld [vmem:[%s2219_s11 + $0x68] sm:$0xff]  ;;  %p1354_p2 = scmp.ne.s32.totalorder %s2076_s23, 2 }
  0x2c   : > { %1709 = vmatprep.subr.bf16.mxu1 %v2243_v15  ;;  %1805 = vmatprep.subr.bf16.mxu0 %v2243_v15  ;;  %v2264_v26 = vpack.c.bf16 %v401_v21, %v398_v20  ;;  %v2269_v29 = vsub.f32 %v332_v24, %v2262_v25  ;;  %v404_v31 = vand.u32 4294901760, %v356_v27  ;;  %v407_v32 = vand.u32 4294901760, %v359_v28  ;;  %v305_v13 = vld [vmem:[%s2211_s18 + $0x8] sm:$0xff] }
  0x2d   : > { %1711 = vmatpush3.bf16.xpose.msra.mxu1 %v2243_v15  ;;  %1807 = vmatpush3.bf16.xpose.msra.mxu0 %v2243_v15  ;;  %v365_v39 = vsel %vm324_vm0, %v315_v34, 0  ;;  %v410_v40 = vand.u32 4294901760, %v362_v38  ;;  %v368_v45 = vsel %vm324_vm0, %v316_v42, 0  ;;  %v2292_v46 = vsub.f32 %v338_v4, %v386_v8 }
  0x2e   : > { %1713 = vmatprep.subr.bf16.mxu1 %v2245_v16  ;;  %1809 = vmatprep.subr.bf16.mxu0 %v2245_v16  ;;  %v468_v30 = vand.u32 4294901760, %v2269_v29  ;;  %v2279_v37 = vpack.c.bf16 %v407_v32, %v404_v31  ;;  %v413_v41 = vand.u32 4294901760, %v365_v39  ;;  %v2294_v47 = vsub.f32 %v341_v5, %v389_v9 }
  0x2f   : > { %v2296_v48 = vsub.f32 %v344_v7, %v392_v11  ;;  %v2298_v49 = vsub.f32 %v347_v10, %v395_v14  ;;  %v371_v50 = vsel %vm324_vm0, %v317_v43, 0  ;;  %v2301_v51 = vsub.f32 %v350_v17, %v398_v20  ;;  %v320_v10 = vld [vmem:[%s2219_s11 + $0x70] sm:$0xff]  ;;  %v321_v11 = vld [vmem:[%s2219_s11 + $0x78] sm:$0xff] }
  0x30   : > { %v469_v35 = vsub.f32 %v2269_v29, %v468_v30  ;;  %1615 = vmatprep.mubr.f32.mxu0 %v468_v30  ;;  %v2289_v44 = vpack.c.bf16 %v413_v41, %v410_v40  ;;  %v2303_v52 = vsub.f32 %v353_v18, %v401_v21  ;;  %v2307_v53 = vpack.c.bf16 %v2294_v47, %v2292_v46 }
  0x31   : > { %v2311_v54 = vpack.c.bf16 %v2298_v49, %v2296_v48  ;;  %v416_v55 = vand.u32 4294901760, %v368_v45  ;;  %v2315_v56 = vsub.f32 %v356_v27, %v404_v31  ;;  %v2317_v57 = vsub.f32 %v359_v28, %v407_v32 }
  0x32   : > { %v470_v36 = vand.u32 4294901760, %v469_v35  ;;  %v419_v58 = vand.u32 4294901760, %v371_v50  ;;  %v2321_v59 = vsub.f32 %v362_v38, %v410_v40  ;;  %v2323_v60 = vsub.f32 %v365_v39, %v413_v41 }
  0x33   : > { %v2327_v61 = vpack.c.bf16 %v2303_v52, %v2301_v51  ;;  %v2333_v0 = vpack.c.bf16 %v2317_v57, %v2315_v56  ;;  %v374_v3 = vsel %vm324_vm0, %v318_v62, 0  ;;  %v377_v4 = vsel %vm324_vm0, %v319_v63, 0 }
  0x34   : > { %1510 = vmatprep.mubr.f32.mxu1 %v470_v36  ;;  %v2337_v1 = vpack.c.bf16 %v2323_v60, %v2321_v59  ;;  %v2339_v2 = vpack.c.bf16 %v419_v58, %v416_v55  ;;  %v2343_v5 = vsub.f32 %v368_v45, %v416_v55  ;;  %v2345_v6 = vsub.f32 %v371_v50, %v419_v58 }
  0x35   : > { %1715 = vmatpush3.bf16.xpose.msra.mxu1 %v2245_v16  ;;  %1811 = vmatpush3.bf16.xpose.msra.mxu0 %v2245_v16  ;;  %v422_v8 = vand.u32 4294901760, %v374_v3  ;;  %v425_v9 = vand.u32 4294901760, %v377_v4  ;;  %v380_v14 = vsel %vm324_vm0, %v320_v10, 0  ;;  %v383_v17 = vsel %vm324_vm0, %v321_v11, 0 }
  0x36   : > { %1717 = vmatprep.subr.bf16.mxu1 %v2264_v26  ;;  %1813 = vmatprep.subr.bf16.mxu0 %v2264_v26  ;;  %v2351_v7 = vpack.c.bf16 %v2345_v6, %v2343_v5  ;;  %v335_v21 = vsel %vm324_vm0, %v305_v13, 0  ;;  %v428_v23 = vand.u32 4294901760, %v380_v14  ;;  %v431_v24 = vand.u32 4294901760, %v383_v17 }
  0x37   : > { %v2357_v12 = vpack.c.bf16 %v425_v9, %v422_v8  ;;  %v2362_v18 = vsub.f32 %v374_v3, %v422_v8  ;;  %v2364_v20 = vsub.f32 %v377_v4, %v425_v9  ;;  %v489_v27 = vand.u32 4294901760, %v2292_v46 }
  0x38   : > { %v496_v28 = vand.u32 4294901760, %v2294_v47  ;;  %v2377_v30 = vand.u32 4294901760, %v335_v21  ;;  %v2379_v31 = vpack.c.bf16 %v431_v24, %v428_v23  ;;  %v2383_v34 = vsub.f32 %v380_v14, %v428_v23 }
  0x39   : > { %v2371_v22 = vpack.c.bf16 %v2364_v20, %v2362_v18  ;;  %v490_v32 = vsub.f32 %v2292_v46, %v489_v27  ;;  %v2385_v35 = vsub.f32 %v383_v17, %v431_v24  ;;  %v503_v41 = vand.u32 4294901760, %v2296_v48 }
  0x3a   : > { %v497_v33 = vsub.f32 %v2294_v47, %v496_v28  ;;  %v2388_v36 = vsub.f32 %v335_v21, %v2377_v30  ;;  %v510_v42 = vand.u32 4294901760, %v2298_v49  ;;  %v1836_v46 = vpack.c.bf16 %v496_v28, %v489_v27 }
  0x3b   : > { %v2394_v38 = vpack.c.bf16 %v2385_v35, %v2383_v34  ;;  %v491_v39 = vand.u32 4294901760, %v490_v32  ;;  %v504_v47 = vsub.f32 %v2296_v48, %v503_v41  ;;  %v517_v58 = vand.u32 4294901760, %v2301_v51 }
  0x3c   : > { %v498_v40 = vand.u32 4294901760, %v497_v33  ;;  %v478_v43 = vand.u32 4294901760, %v2388_v36  ;;  %v511_v50 = vsub.f32 %v2298_v49, %v510_v42  ;;  %v524_v3 = vand.u32 4294901760, %v2303_v52 }
  0x3d   : > { %1719 = vmatpush3.bf16.xpose.msra.mxu1 %v2264_v26  ;;  %1815 = vmatpush3.bf16.xpose.msra.mxu0 %v2264_v26  ;;  %v505_v62 = vand.u32 4294901760, %v504_v47  ;;  %v518_v8 = vsub.f32 %v2301_v51, %v517_v58  ;;  %v1840_v9 = vpack.c.bf16 %v510_v42, %v503_v41  ;;  %v322_v10 = vmul.f32 %v2254_v19, %v2254_v19 }
  0x3e   : > { %1721 = vmatprep.subr.bf16.mxu1 %v2279_v37  ;;  %1817 = vmatprep.subr.bf16.mxu0 %v2279_v37  ;;  %v1740_v45 = vpack.c.bf16 %v498_v40, %v491_v39  ;;  %v479_v55 = vsub.f32 %v2388_v36, %v478_v43  ;;  %v512_v63 = vand.u32 4294901760, %v511_v50  ;;  %v525_v49 = vsub.f32 %v2303_v52, %v524_v3 }
  0x3f   : > { %v519_v11 = vand.u32 4294901760, %v518_v8  ;;  %v323_v14 = vmul.f32 %v305_v13, %v305_v13  ;;  %v531_v21 = vand.u32 4294901760, %v2315_v56  ;;  %v538_v51 = vand.u32 4294901760, %v2317_v57 }
  0x40   : > { %v480_v4 = vand.u32 4294901760, %v479_v55  ;;  %v1744_v48 = vpack.c.bf16 %v512_v63, %v505_v62  ;;  %v526_v17 = vand.u32 4294901760, %v525_v49  ;;  %v325_v23 = vsel %vm324_vm0, %v322_v10, 0.0 }
  0x41   : > { %326 = vadd.xlane.f32.xlu0 %v325_v23  ;;  %v328_v19 = vsel %vm324_vm0, %v323_v14, 0.0  ;;  %v1844_v24 = vpack.c.bf16 %v524_v3, %v517_v58  ;;  %v532_v13 = vsub.f32 %v2315_v56, %v531_v21  ;;  %v539_v27 = vsub.f32 %v2317_v57, %v538_v51 }
  0x42   : > { %v1748_v52 = vpack.c.bf16 %v526_v17, %v519_v11  ;;  %v545_v33 = vand.u32 4294901760, %v2321_v59  ;;  %v552_v39 = vand.u32 4294901760, %v2323_v60  ;;  %v1848_v41 = vpack.c.bf16 %v538_v51, %v531_v21 }
  0x43   : > { %v533_v28 = vand.u32 4294901760, %v532_v13  ;;  %v540_v32 = vand.u32 4294901760, %v539_v27  ;;  %v573_v62 = vand.u32 4294901760, %v2362_v18  ;;  %v580_v63 = vand.u32 4294901760, %v2364_v20 }
  0x44   : > { %v546_v42 = vsub.f32 %v2321_v59, %v545_v33  ;;  %v1852_v50 = vpack.c.bf16 %v552_v39, %v545_v33  ;;  %v594_v49 = vand.u32 4294901760, %v2385_v35 }
  0x45   : > { %1723 = vmatpush3.bf16.xpose.msra.mxu1 %v2279_v37  ;;  %1819 = vmatpush3.bf16.xpose.msra.mxu0 %v2279_v37  ;;  %v1752_v40 = vpack.c.bf16 %v540_v32, %v533_v28  ;;  %v574_v8 = vsub.f32 %v2362_v18, %v573_v62  ;;  %v1860_v11 = vpack.c.bf16 %v580_v63, %v573_v62 }
  0x46   : > { %1725 = vmatprep.subr.bf16.mxu1 %v2289_v44  ;;  %1821 = vmatprep.subr.bf16.mxu0 %v2289_v44  ;;  %v547_v56 = vand.u32 4294901760, %v546_v42  ;;  %v595_v17 = vsub.f32 %v2385_v35, %v594_v49  ;;  %v1093_v42 = vld [vmem:[#allocation2] sm:$0xff] }
  0x47   : > { %329 = vadd.xlane.f32.xlu0 %v328_v19 }
  0x4d   : > { %1727 = vmatpush3.bf16.xpose.msra.mxu1 %v2289_v44  ;;  %1823 = vmatpush3.bf16.xpose.msra.mxu0 %v2289_v44 }
  0x4e   : > { %1729 = vmatprep.subr.bf16.mxu1 %v2339_v2  ;;  %1825 = vmatprep.subr.bf16.mxu0 %v2339_v2 }
  0x55   : > { %1731 = vmatpush3.bf16.xpose.msra.mxu1 %v2339_v2  ;;  %1827 = vmatpush3.bf16.xpose.msra.mxu0 %v2339_v2 }
  0x56   : > { %1733 = vmatprep.subr.bf16.mxu1 %v2357_v12  ;;  %1829 = vmatprep.subr.bf16.mxu0 %v2357_v12 }
  0x5d   : > { %1735 = vmatpush3.bf16.xpose.msra.mxu1 %v2357_v12  ;;  %1831 = vmatpush3.bf16.xpose.msra.mxu0 %v2357_v12 }
  0x5e   : > { %1737 = vmatprep.subr.bf16.mxu1 %v2379_v31  ;;  %1833 = vmatprep.subr.bf16.mxu0 %v2379_v31 }
  0x65   : > { %1739 = vmatpush3.bf16.xpose.msra.mxu1 %v2379_v31  ;;  %1835 = vmatpush3.bf16.xpose.msra.mxu0 %v2379_v31 }
  0x66   : > { %1741 = vmatprep.subr.bf16.mxu1 %v1740_v45  ;;  %1837 = vmatprep.subr.bf16.mxu0 %v1836_v46 }
  0x6c   : > { %1511 = vmatmul.mubr.f32.vlgmr.msra.gmra.mrb[0].mxu1 %v480_v4  ;;  %1616 = vmatmul.mubr.f32.vlgmr.msra.gmra.mrb[0].mxu0 %v478_v43  ;;  %v553_v43 = vsub.f32 %v2323_v60, %v552_v39 }
  0x6d   : > { %1743 = vmatpush3.bf16.xpose.msra.mxu1 %v1740_v45  ;;  %1839 = vmatpush3.bf16.xpose.msra.mxu0 %v1836_v46  ;;  %v559_v45 = vand.u32 4294901760, %v2343_v5  ;;  %v566_v46 = vand.u32 4294901760, %v2345_v6 }
  0x6e   : > { %1745 = vmatprep.subr.bf16.mxu1 %v1744_v48  ;;  %1841 = vmatprep.subr.bf16.mxu0 %v1840_v9  ;;  %v554_v57 = vand.u32 4294901760, %v553_v43 }
  0x6f   : > { %1545 = vmatprep.mubr.f32.mxu1 %v2262_v25  ;;  %1650 = vmatprep.mubr.f32.mxu0 %v2262_v25  ;;  %v560_v55 = vsub.f32 %v2343_v5, %v559_v45  ;;  %v567_v58 = vsub.f32 %v2345_v6, %v566_v46  ;;  %v1856_v4 = vpack.c.bf16 %v566_v46, %v559_v45  ;;  %v575_v5 = vand.u32 4294901760, %v574_v8 }
  0x70   : > { %v1756_v47 = vpack.c.bf16 %v554_v57, %v547_v56  ;;  %v1094_v56 = vld [vmem:[#allocation2 + $0x8] sm:$0xff] }
  0x71   : > { %v561_v59 = vand.u32 4294901760, %v560_v55  ;;  %v568_v60 = vand.u32 4294901760, %v567_v58 }
  0x73   : > { %v1760_v3 = vpack.c.bf16 %v568_v60, %v561_v59 }
  0x75   : > { %1747 = vmatpush3.bf16.xpose.msra.mxu1 %v1744_v48  ;;  %1843 = vmatpush3.bf16.xpose.msra.mxu0 %v1840_v9  ;;  %v581_v48 = vsub.f32 %v2364_v20, %v580_v63  ;;  %v587_v9 = vand.u32 4294901760, %v2383_v34  ;;  %v596_v20 = vand.u32 4294901760, %v595_v17 }
  0x76   : > { %1749 = vmatprep.subr.bf16.mxu1 %v1748_v52  ;;  %1845 = vmatprep.subr.bf16.mxu0 %v1844_v24 }
  0x77   : > { %v582_v6 = vand.u32 4294901760, %v581_v48  ;;  %v588_v14 = vsub.f32 %v2383_v34, %v587_v9  ;;  %v1864_v51 = vpack.c.bf16 %v594_v49, %v587_v9 }
  0x79   : > { %v1764_v10 = vpack.c.bf16 %v582_v6, %v575_v5  ;;  %v589_v18 = vand.u32 4294901760, %v588_v14 }
  0x7b   : > { %v1768_v21 = vpack.c.bf16 %v596_v20, %v589_v18 }
  0x7d   : > { %1751 = vmatpush3.bf16.xpose.msra.mxu1 %v1748_v52  ;;  %1847 = vmatpush3.bf16.xpose.msra.mxu0 %v1844_v24  ;;  %v1085_v52 = vstv %s1084_s25 }
  0x7e   : > { %1753 = vmatprep.subr.bf16.mxu1 %v1752_v40  ;;  %1849 = vmatprep.subr.bf16.mxu0 %v1848_v41 }
  0x85   : > { %1755 = vmatpush3.bf16.xpose.msra.mxu1 %v1752_v40  ;;  %1851 = vmatpush3.bf16.xpose.msra.mxu0 %v1848_v41 }
  0x86   : > { %1757 = vmatprep.subr.bf16.mxu1 %v1756_v47  ;;  %1853 = vmatprep.subr.bf16.mxu0 %v1852_v50 }
  0x8d   : > { %1759 = vmatpush3.bf16.xpose.msra.mxu1 %v1756_v47  ;;  %1855 = vmatpush3.bf16.xpose.msra.mxu0 %v1852_v50 }
  0x8e   : > { %1761 = vmatprep.subr.bf16.mxu1 %v1760_v3  ;;  %1857 = vmatprep.subr.bf16.mxu0 %v1856_v4 }
  0x95   : > { %1763 = vmatpush3.bf16.xpose.msra.mxu1 %v1760_v3  ;;  %1859 = vmatpush3.bf16.xpose.msra.mxu0 %v1856_v4 }
  0x96   : > { %1765 = vmatprep.subr.bf16.mxu1 %v1764_v10  ;;  %1861 = vmatprep.subr.bf16.mxu0 %v1860_v11 }
  0x9d   : > { %1767 = vmatpush3.bf16.xpose.msra.mxu1 %v1764_v10  ;;  %1863 = vmatpush3.bf16.xpose.msra.mxu0 %v1860_v11 }
  0x9e   : > { %1769 = vmatprep.subr.bf16.mxu1 %v1768_v21  ;;  %1865 = vmatprep.subr.bf16.mxu0 %v1864_v51 }
  0xa5   : > { %1771 = vmatpush3.bf16.xpose.msra.mxu1 %v1768_v21  ;;  %1867 = vmatpush3.bf16.xpose.msra.mxu0 %v1864_v51 }
  0xa6   : > { %1773 = vmatprep.subr.bf16.mxu1 %v2307_v53  ;;  %1869 = vmatprep.subr.bf16.mxu0 %v2243_v15 }
  0xac   : > { %1546 = vmatmul.mubr.f32.vlgmr.msra.gmra.mrb[0].mxu1 %v2377_v30  ;;  %1651 = vmatmul.mubr.f32.vlgmr.msra.gmra.mrb[0].mxu0 %v2377_v30 }
  0xad   : > { %1775 = vmatpush3.bf16.xpose.msra.mxu1 %v2307_v53  ;;  %1871 = vmatpush3.bf16.xpose.msra.mxu0 %v2243_v15  ;;  %v2095_v15 = vmov 0.0   ;;  %v1992_v53 = vld [vmem:[%s2228_s15 + $0x30] sm:$0xff]  }
  0xae   : > { %1777 = vmatprep.subr.bf16.mxu1 %v2311_v54  ;;  %1873 = vmatprep.subr.bf16.mxu0 %v2245_v16 }
  0xaf   : > { %1580 = vmatprep.mubr.f32.mxu1 %v2269_v29  ;;  %1685 = vmatprep.mubr.f32.mxu0 %v2262_v25  ;;  %v1987_v25 = vld [vmem:[%s2228_s15 + $0x8] sm:$0xff]   ;;  %v1989_v29 = vld [vmem:[%s2228_s15 + $0x18] sm:$0xff]  }
  0xb5   : > { %1779 = vmatpush3.bf16.xpose.msra.mxu1 %v2311_v54  ;;  %1875 = vmatpush3.bf16.xpose.msra.mxu0 %v2245_v16  ;;  %v1986_v16 = vld [vmem:[%s2228_s15] sm:$0xff]   ;;  %v1993_v54 = vld [vmem:[%s2228_s15 + $0x38] sm:$0xff]  }
  0xb6   : > { %1781 = vmatprep.subr.bf16.mxu1 %v2327_v61  ;;  %1877 = vmatprep.subr.bf16.mxu0 %v2264_v26 }
  0xbd   : > { %1783 = vmatpush3.bf16.xpose.msra.mxu1 %v2327_v61  ;;  %1879 = vmatpush3.bf16.xpose.msra.mxu0 %v2264_v26  ;;  %v1988_v26 = vld [vmem:[%s2228_s15 + $0x10] sm:$0xff]  }
  0xbe   : > { %1785 = vmatprep.subr.bf16.mxu1 %v2333_v0  ;;  %1881 = vmatprep.subr.bf16.mxu0 %v2279_v37 }
  0xc5   : > { %1787 = vmatpush3.bf16.xpose.msra.mxu1 %v2333_v0  ;;  %1883 = vmatpush3.bf16.xpose.msra.mxu0 %v2279_v37  ;;  %v1990_v37 = vld [vmem:[%s2228_s15 + $0x20] sm:$0xff]  }
  0xc6   : > { %1789 = vmatprep.subr.bf16.mxu1 %v2337_v1  ;;  %1885 = vmatprep.subr.bf16.mxu0 %v2289_v44 }
  0xcd   : > { %1791 = vmatpush3.bf16.xpose.msra.mxu1 %v2337_v1  ;;  %1887 = vmatpush3.bf16.xpose.msra.mxu0 %v2289_v44  ;;  %v1991_v44 = vld [vmem:[%s2228_s15 + $0x28] sm:$0xff]   ;;  %v1345_v1 = vld [vmem:[%s289_s12] ss:$0 sm:$0xff] }
  0xce   : > { %1793 = vmatprep.subr.bf16.mxu1 %v2351_v7  ;;  %1889 = vmatprep.subr.bf16.mxu0 %v2339_v2  ;;  %v327_v61 = vpop.xlane.xlu0 %326 }
  0xd4   : > { %v330_v0 = vpop.xlane.xlu0 %329 }
  0xd5   : > { %1795 = vmatpush3.bf16.xpose.msra.mxu1 %v2351_v7  ;;  %1891 = vmatpush3.bf16.xpose.msra.mxu0 %v2339_v2 }
  0xd6   : > { %1797 = vmatprep.subr.bf16.mxu1 %v2371_v22  ;;  %1893 = vmatprep.subr.bf16.mxu0 %v2357_v12 }
  0xdd   : > { %1799 = vmatpush3.bf16.xpose.msra.mxu1 %v2371_v22  ;;  %1895 = vmatpush3.bf16.xpose.msra.mxu0 %v2357_v12 }
  0xde   : > { %1801 = vmatprep.subr.bf16.mxu1 %v2394_v38  ;;  %1897 = vmatprep.subr.bf16.mxu0 %v2379_v31 }
  0xe5   : > { %1803 = vmatpush3.bf16.xpose.msra.mxu1 %v2394_v38  ;;  %1899 = vmatpush3.bf16.xpose.msra.mxu0 %v2379_v31  ;;  %v1077_v31 = vadd.f32 %v1345_v1, %v330_v0 }
  0xe6   : > { %1688 = vmatprep.subr.bf16.mxu1 %v2095_v15 }
  0xec   : > { %1581 = vmatmul.mubr.f32.vlgmr.msra.gmra.mrb[0].mxu1 %v2388_v36  ;;  %1686 = vmatmul.mubr.f32.vlgmr.msra.gmra.mrb[0].mxu0 %v2377_v30  ;;  %v1076_v36 = vadd.f32 %v1345_v1, %v327_v61 }
  0xed   : > { %1689 = vmatpush3.bf16.msra.mxu1 %v1986_v16  ;;  %1704 = vmatprep.mubr.msk.bf16.mxu1 %vm2096_vm1, %v2095_v15 }
  0xee   : > { %1690 = vmatprep.subr.bf16.mxu1 %v2095_v15 }
  0xf1   : > { %1691 = vmatpush3.bf16.msra.mxu1 %v1987_v25 }
  0xf2   : > { %1692 = vmatprep.subr.bf16.mxu1 %v2095_v15 }
  0xf5   : > { %1693 = vmatpush3.bf16.msra.mxu1 %v1988_v26 }
  0xf6   : > { %1694 = vmatprep.subr.bf16.mxu1 %v2095_v15 }
  0xf9   : > { %1695 = vmatpush3.bf16.msra.mxu1 %v1989_v29 }
  0xfa   : > { %1696 = vmatprep.subr.bf16.mxu1 %v2095_v15 }
  0xfd   : > { %1697 = vmatpush3.bf16.msra.mxu1 %v1990_v37 }
  0xfe   : > { %1698 = vmatprep.subr.bf16.mxu1 %v2095_v15 }
 0x101   : > { %1699 = vmatpush3.bf16.msra.mxu1 %v1991_v44 }
 0x102   : > { %1700 = vmatprep.subr.bf16.mxu1 %v2095_v15 }
 0x105   : > { %1701 = vmatpush3.bf16.msra.mxu1 %v1992_v53 }
 0x106   : > { %1702 = vmatprep.subr.bf16.mxu1 %v2095_v15 }
 0x109   : > { %1703 = vmatpush3.bf16.msra.mxu1 %v1993_v54 }
 0x1bf   : > { %v1582_v2 = vpop.f32.mrb[0].mxu1  ;;  %v1687_v7 = vpop.f32.mrb[0].mxu0 }
 0x1c0   : > { %v1900_v12 = vadd.f32 %v1687_v7, %v1582_v2  ;;  %v743_v22 = vpop.f32.mrb[1].mxu1  ;;  %v1059_v30 = vpop.f32.mrb[1].mxu0 }
 0x1c1   : > { %v1901_v34 = vadd.f32 %v1059_v30, %v743_v22 }
 0x1c2   : > { %v1079_v35 = vmul.f32 2.0, %v1900_v12 }
 0x1c3   : > { %v1078_v38 = vmul.f32 2.0, %v1901_v34 }
 0x1c4   : > { %v1081_v23 = vsub.f32 %v1077_v31, %v1079_v35 }
 0x1c5   : > { %v1080_v19 = vsub.f32 %v1076_v36, %v1078_v38 }
 0x1c6   : > { %v1083_v24 = vmax.f32 %v1081_v23, 0.0 }
 0x1c7   : > { %v1082_v13 = vmax.f32 %v1080_v19, 0.0 }
 0x1c8   : > { %v1087_v27 = vmul.f32 %v1085_v52, %v1083_v24 }
 0x1c9   : > { %v1086_v28 = vmul.f32 %v1085_v52, %v1082_v13 }
 0x1ca   : > { %v1090_v32 = vmul.f32 1.442695, %v1087_v27 }
 0x1cb   : > { %v1088_v33 = vmul.f32 1.442695, %v1086_v28 }
 0x1cc   : > { %1994 = vpow2.f32 %v1090_v32 }
 0x1cd   : > { %1996 = vpow2.f32 %v1088_v33 }
 0x1d6   : > { %v1995_v39 = vpop.eup %1994 }
 0x1d7   : > { %v1997_v40 = vpop.eup %1996 }
 0x1d8   : > { %v1092_v41 = vpack.c.bf16 %v1995_v39, %v1997_v40 }
 0x1da   : > { %1705 = vmatmul.mubr.bf16.vlgmr.msra.gmra.mrb[4].mxu1 %v1092_v41 }
 0x2ac   : > { %1207 = sbr.rel (%p1354_p2) target bundleno = 699 (0x2bb), region = 48 }
 0x2ad   : > { %v1193_v43 = vpop.f32.mrb[4].mxu1 }
 0x2ae   : > { %v1200_v57 = vadd.f32 %v1193_v43, %v1093_v42  ;;  %v1706_v45 = vpop.f32.mrb[5].mxu1 }
 0x2af   : > { %v1196_v46 = vpop.f32.mrb[6].mxu1 }
 0x2b0   : > { %1202 = vst [vmem:[#allocation2] sm:$0xff] %v1200_v57  ;;  %v1201_v47 = vadd.f32 %v1196_v46, %v1094_v56  ;;  %v1707_v50 = vpop.f32.mrb[7].mxu1 }
 0x2b2   : > { %1203 = vst [vmem:[#allocation2 + $0x8] sm:$0xff] %v1201_v47 }
 0x2b7   : > { %v1208_v55 = vld [vmem:[#allocation2] sm:$0xff] }
 0x2b8   : > { %1210 = vst [vmem:[%s2230_s16] sm:$0xff] %v1208_v55 }
 0x2b9   : > { %v1209_v58 = vld [vmem:[#allocation2 + $0x8] sm:$0xff] }
 0x2ba   : > { %1211 = vst [vmem:[%s2230_s16 + $0x8] sm:$0xff] %v1209_v58 }
 0x2bb PF: > { %s1360_s30 = sshll.u32 %s2080_s24, 8  ;;  %s1226_s17 = sshll.u32 %s2230_s16, 4  ;;  %s2497_s17 = int_to_ptr.vmem [resolvable:$true] %s1226_s17 }
 0x2bc   : > { %s2494_s14 = scalar_lea.hbm %s2558_s5, %s1360_s30  ;;  %s2569_s23 = sand.u32 1, %s2068_s21  }
 0x2bd   : > { %s2501_s18 = scalar_lea.sflag [#allocation5], %s2569_s23  ;;  %s1998_s19 = scalar_lea.vmem %s2497_s17, 256 }
 0x2be   : > { %p1999_p4 = scmp.ne.s32.totalorder %s2497_s17, %s1998_s19  ;;  %s2097_s24 = smov [#allocation4]  }
 0x2bf   : > { %s2002_s0 = sshll.u32 %s2097_s24, 4  ;;  %s2003_s0 = int_to_ptr.vmem [resolvable:$false] %s2002_s0 }
 0x2c0   : > { %p2000_p5 = pnand %p1999_p4, %p2182_p3  ;;  %s2004_s28 = scalar_lea.vmem %s2003_s0, 512 }
 0x2c1   : > { %p2005_p7 = scmp.lt.s32.totalorder %s2497_s17, %s2003_s0  ;;  %p2006_p8 = scmp.lt.s32.totalorder %s2004_s28, %s1998_s19 }
 0x2c2   : > { %p2001_p6 = pneg %p2000_p5 }
 0x2c3   : > { %p2007_p10 = por %p2006_p8, %p2005_p7 }
 0x2c5   : > { %p2008_p11 = pnand %p2007_p10, %p2001_p6 }
 0x2c7   : > { %2011 = shalt.err (!%p2008_p11)
}
 0x2c8   : > { %s2012_s8 = scalar_lea.hbm %s2494_s14, 256  ;;  %s2016_s15 = scalar_lea.hbm %s2558_s5, 512 }
 0x2c9   : > { %p2013_p12 = scmp.ne.s32.totalorder %s2494_s14, %s2012_s8  ;;  %p2017_p1 = scmp.lt.u32.totalorder %s2494_s14, %s2558_s5 }
 0x2ca   : > { %p2018_p2 = scmp.lt.u32.totalorder %s2016_s15, %s2012_s8  ;;  %p2020_p5 = scmp.lt.u32.totalorder %s2012_s8, %s2494_s14 }
 0x2cb   : > { %p2014_p13 = pnand %p2013_p12, %p2182_p3 }
 0x2cc   : > { %p2019_p4 = por %p2018_p2, %p2017_p1 }
 0x2cd   : > { %p2015_p0 = pneg %p2014_p13 }
 0x2ce   : > { %p2021_p6 = por %p2020_p5, %p2019_p4 }
 0x2d0   : > { %p2022_p7 = pnand %p2021_p6, %p2015_p0 }
 0x2d2   : > { %2025 = shalt.err (!%p2022_p7)
}
 0x2d3   : > { %s2098_s26 = smov 128   ;;  %s2099_s29 = smov 8  }
 0x2d4   : > { %1910 = dma.vmem_to_hbm [thread:$0]  (%p2182_p3), %s2497_s17, 256, %s2494_s14, %s2501_s18, %s2098_s26, %s2098_s26, %s2099_s29  }
 0x2d5 PF: > { %p1916_p8 = scmp.ge.s32.totalorder %s2092_s27, 2  ;;  %s1241_s30 = sand.u32 1, %s2064_s20  }
 0x2d6   : > { %s1242_s11 = scalar_lea.sflag [#allocation5], %s1241_s30 }
 0x2d7   : > { %p1913_p10 = pnand %p1916_p8, %p2192_p9 }
 0x2d9   : > { %2059 = dma.done.wait (!%p1913_p10), %s1242_s11, 256  }
 0x2da   : > { %2061 = vsyncadd (!%p1913_p10), %s1242_s11, 4294967040  ;;  %s19_s27 = sadd.s32 1, %s2092_s27   ;;  %s2570_s23 = sld [smem:[#allocation7_spill]] }
 0x2db   : > { %p16_p11 = scmp.ge.s32.totalorder %s19_s27, 8   ;;  %s2571_s24 = sld [smem:[#allocation8_spill]] }
 0x2dc   : > { %s2572_s25 = sld [smem:[#allocation9_spill]]  ;;  %s2573_s26 = sld [smem:[#allocation10_spill]] }
 0x2dd   : > { %s2574_s20 = smov %s2068_s21  ;;  %s2575_s21 = smov %s2072_s22 }
 0x2de   : > { %s2576_s22 = smov %s2200_s10  ;;  %18 = sbr.rel (!%p16_p11) target bundleno = 7 (0x7), region = 92 }
 0x2e5   :  { %1247 = vsyncpa [#allocation5], 1 }
 0x2e6   :  { %1249 = vsyncpa [#allocation5 + $0x1], 1 }

</bundles_post_ra>
